<compile_context>
chip_gen: v7x
topology: tpu7x:2x2x1
jax: 0.10.0
libtpu: 0.0.40
codegen_flags: <defaults>
</compile_context>

<pallas_src>
import numpy as np
import jax
import jax.numpy as jnp
from jax import lax
from jax.experimental import pallas as pl
from jax.experimental.pallas import tpu as pltpu


def _yolo_kernel(nx, n, approx_recip):
    """Kernel body closing over static nx / lane count / precision flag."""
    inv_nx = 1.0 / float(nx)
    nx_f = float(nx)

    def kernel(x_ref, coef_ref, o_ref):
        # x_ref   : (TB, 1, O, N) raw predictions for one anchor (native dtype)
        # coef_ref: (1, 4, O, 1)  rows: S (sigmoid scale), W (anchor w/h),
        #                         Mx (stride on ch0), My (stride on ch1)
        x = x_ref[...].astype(jnp.float32)

        # One transcendental per element; clamp keeps exp finite so that
        # ex * 0 on the class/objectness channels never produces NaN, and the
        # derived sigmoid still saturates to 1.0 for large logits.
        ex = jnp.exp(jnp.minimum(x, 80.0))

        c = coef_ref[...]          # (1, 4, O, 1)
        s_vec = c[0, 0]            # (O, 1)  [stride, stride, 0, 0, 1, 1, ...]
        w_vec = c[0, 1]            # (O, 1)  [0, 0, aw, ah, 0, ...]
        mx_vec = c[0, 2]           # (O, 1)  [stride, 0, 0, ...]
        my_vec = c[0, 3]           # (O, 1)  [0, stride, 0, ...]

        # Cell grid from the lane index (no HBM side input).  Float divmod is
        # exact while |(col+0.5)/nx| stays >= 0.5/nx from integers, true for
        # any YOLO-sized head (guarded by the wrapper assert on N).
        col = lax.broadcasted_iota(jnp.int32, (1, n), 1).astype(jnp.float32)
        gy = jnp.floor((col + 0.5) * inv_nx)     # (1, N)
        gx = col - gy * nx_f                     # (1, N)
        gterm = gx * mx_vec + gy * my_vec        # (O, N), hoisted once

        # sigmoid = ex / (1 + ex); factored so the whole output is
        #   out = ex * (S * r + W) + gterm
        denom = 1.0 + ex
        if approx_recip:
            r = pl.reciprocal(denom, approx=True)   # EUP slot, ~free
        else:
            r = 1.0 / denom                         # exact for f32 output
        out = ex * (s_vec * r + w_vec) + gterm
        o_ref[...] = out.astype(o_ref.dtype)

    return kernel


def yolo_layer_forward(x, anchors, img_size, *, native_layout=False,
                       out_dtype=None):
    """x: (B, A*O, ny, nx) NCHW (any float dtype); anchors: (A, 2) float32."""
    B, C, ny, nx = x.shape
    A = anchors.shape[0]
    O = C // A
    N = ny * nx
    stride = img_size // ny                 # PyTorch: img_size // x.size(2)
    out_dtype = x.dtype if out_dtype is None else np.dtype(out_dtype)

    # Guard for the in-kernel float-divmod cell-grid trick.
    assert N < (1 << 22), "cell-grid float divmod assumes ny*nx < 2**22"

    # (B, A*O, ny, nx) -> (B, A, O, ny*nx); free reshape of contiguous NCHW.
    x5 = x.reshape(B, A, O, N)

    # One tiny coefficient operand: (A, 4, O, 1), broadcast along lanes.
    sf = float(stride)
    s_vec = jnp.concatenate([jnp.full((2,), sf, jnp.float32),
                             jnp.zeros((2,), jnp.float32),
                             jnp.ones((O - 4,), jnp.float32)])
    mx_vec = jnp.zeros((O,), jnp.float32).at[0].set(sf)
    my_vec = jnp.zeros((O,), jnp.float32).at[1].set(sf)
    w_rows = jnp.zeros((A, O), jnp.float32)
    w_rows = w_rows.at[:, 2].set(anchors[:, 0].astype(jnp.float32))
    w_rows = w_rows.at[:, 3].set(anchors[:, 1].astype(jnp.float32))
    coef = jnp.stack([jnp.broadcast_to(s_vec, (A, O)),
                      w_rows,
                      jnp.broadcast_to(mx_vec, (A, O)),
                      jnp.broadcast_to(my_vec, (A, O))],
                     axis=1).reshape(A, 4, O, 1)

    # Batch-tile sized from the real dtypes and the f32 working set:
    # double-buffered in+out blocks plus ~3 full-shape f32 intermediates.
    in_isz = x.dtype.itemsize
    out_isz = np.dtype(out_dtype).itemsize
    row_bytes = O * N * (2 * in_isz + 2 * out_isz + 3 * 4)
    tb = max(1, min(B, (10 * 1024 * 1024) // max(row_bytes, 1)))
    while B % tb:
        tb -= 1

    # VMEM limit derived from actual block bytes, capped well under v7x's
    # 64 MiB physical VMEM (harmless on v5e/v6e's 128 MiB).
    vmem_need = tb * row_bytes + (1 << 20)
    vmem_limit = int(min(48 * 1024 * 1024, max(vmem_need, 16 * 1024 * 1024)))

    grid = (B // tb, A)

    out = pl.pallas_call(
        _yolo_kernel(nx, N, out_isz <= 2),
        out_shape=jax.ShapeDtypeStruct((B, A, O, N), out_dtype),
        grid=grid,
        in_specs=[
            pl.BlockSpec((tb, 1, O, N), lambda b, a: (b, a, 0, 0)),
            pl.BlockSpec((1, 4, O, 1), lambda b, a: (a, 0, 0, 0)),
        ],
        out_specs=pl.BlockSpec((tb, 1, O, N), lambda b, a: (b, a, 0, 0)),
        compiler_params=pltpu.CompilerParams(
            dimension_semantics=("parallel", "parallel"),
            vmem_limit_bytes=vmem_limit),
    )(x5, coef)

    if native_layout:
        # Kernel-native (B, A, O, ny*nx): skips a second full-tensor HBM pass.
        return out

    # PyTorch contract glue (single fused XLA transpose; the kernel output
    # stays lane-dense — no in-kernel transpose to a lane-width-O layout):
    # (B, A, O, ny*nx) -> (B, A, ny*nx, O) -> (B, A*ny*nx, O), matching
    # view(B, A, O, ny, nx).permute(0,1,3,4,2).view(B, -1, O).
    return out.transpose(0, 1, 3, 2).reshape(B, A * N, O)


def yolo_layer_ref(x, anchors, img_size):
    """Pure-JAX reference mirroring the PyTorch eval forward exactly."""
    B, C, ny, nx = x.shape
    A = anchors.shape[0]
    O = C // A
    stride = img_size // ny
    xr = x.reshape(B, A, O, ny, nx).transpose(0, 1, 3, 4, 2)  # (B, A, ny, nx, O)
    yv, xv = jnp.meshgrid(jnp.arange(ny), jnp.arange(nx), indexing="ij")
    grid = jnp.stack((xv, yv), 2).reshape(1, 1, ny, nx, 2).astype(jnp.float32)
    anchor_grid = anchors.reshape(1, A, 1, 1, 2)
    xy = (jax.nn.sigmoid(xr[..., 0:2]) + grid) * stride
    wh = jnp.exp(xr[..., 2:4]) * anchor_grid
    rest = jax.nn.sigmoid(xr[..., 4:])
    return jnp.concatenate([xy, wh, rest], axis=-1).reshape(B, -1, O)


if __name__ == "__main__":
    # Small, deterministic setup consistent with the module:
    #   num_classes = 3 -> num_outputs = 8; 3 anchors -> input channels = 24.
    num_classes = 3
    O = num_classes + 5
    anchors = jnp.asarray([(10.0, 13.0), (16.0, 30.0), (33.0, 23.0)],
                          dtype=jnp.float32)                      # (A, 2)
    A = anchors.shape[0]
    img_size = 416

    key = jax.random.PRNGKey(0)
    # Two heads: 16x16 (lane-aligned) and a real YOLO 13x13 (masked tail, B=1).
    for (B, ny) in [(2, 16), (1, 13)]:
        nx = ny
        key, sub = jax.random.split(key)
        x = jax.random.normal(sub, (B, A * O, ny, nx), dtype=jnp.float32)

        out = jax.block_until_ready(yolo_layer_forward(x, anchors, img_size))
        ref = yolo_layer_ref(x, anchors, img_size)

        assert out.shape == (B, A * ny * nx, O), out.shape
        np.testing.assert_allclose(np.asarray(out), np.asarray(ref),
                                   rtol=1e-5, atol=1e-5)
    print("KERNEL_OK")
</pallas_src>

<mosaic_0001>
module attributes {stable_mosaic.version = 11 : i64} {
  func.func @kernel(%arg0: i32, %arg1: i32, %arg2: memref<2x1x8x256xf32, #tpu.memory_space<vmem>>, %arg3: memref<1x4x8x1xf32, #tpu.memory_space<vmem>>, %arg4: memref<2x1x8x256xf32, #tpu.memory_space<vmem>>) attributes {dimension_semantics = [#tpu.dimension_semantics<parallel>, #tpu.dimension_semantics<parallel>], iteration_bounds = array<i64: 1, 3>, scalar_prefetch = 0 : i64, scratch_operands = 0 : i64, tpu.core_type = #tpu.core_type<tc>, window_params = [{transform_indices = @transform_0, window_bounds = array<i64: 2, 1, 8, 256>}, {transform_indices = @transform_1, window_bounds = array<i64: 1, 4, 8, 1>}, {transform_indices = @transform_2, window_bounds = array<i64: 2, 1, 8, 256>}]} {
    %c0 = arith.constant 0 : index
    %c0_0 = arith.constant 0 : index
    %c0_1 = arith.constant 0 : index
    %c0_2 = arith.constant 0 : index
    %0 = vector.load %arg2[%c0, %c0_0, %c0_1, %c0_2] : memref<2x1x8x256xf32, #tpu.memory_space<vmem>>, vector<2x1x8x256xf32>
    %cst = arith.constant 8.000000e+01 : f32
    %1 = vector.broadcast %cst : f32 to vector<2x1x8x256xf32>
    %2 = arith.minimumf %0, %1 : vector<2x1x8x256xf32>
    %3 = math.exp %2 : vector<2x1x8x256xf32>
    %c0_3 = arith.constant 0 : index
    %c0_4 = arith.constant 0 : index
    %c0_5 = arith.constant 0 : index
    %c0_6 = arith.constant 0 : index
    %4 = vector.load %arg3[%c0_3, %c0_4, %c0_5, %c0_6] : memref<1x4x8x1xf32, #tpu.memory_space<vmem>>, vector<1x4x8x1xf32>
    %5 = vector.extract_strided_slice %4 {offsets = [0, 0, 0, 0], sizes = [1, 1, 8, 1], strides = [1, 1, 1, 1]} : vector<1x4x8x1xf32> to vector<1x1x8x1xf32>
    %6 = vector.shape_cast %5 : vector<1x1x8x1xf32> to vector<8x1xf32>
    %7 = vector.extract_strided_slice %4 {offsets = [0, 1, 0, 0], sizes = [1, 1, 8, 1], strides = [1, 1, 1, 1]} : vector<1x4x8x1xf32> to vector<1x1x8x1xf32>
    %8 = vector.shape_cast %7 : vector<1x1x8x1xf32> to vector<8x1xf32>
    %9 = vector.extract_strided_slice %4 {offsets = [0, 2, 0, 0], sizes = [1, 1, 8, 1], strides = [1, 1, 1, 1]} : vector<1x4x8x1xf32> to vector<1x1x8x1xf32>
    %10 = vector.shape_cast %9 : vector<1x1x8x1xf32> to vector<8x1xf32>
    %11 = vector.extract_strided_slice %4 {offsets = [0, 3, 0, 0], sizes = [1, 1, 8, 1], strides = [1, 1, 1, 1]} : vector<1x4x8x1xf32> to vector<1x1x8x1xf32>
    %12 = vector.shape_cast %11 : vector<1x1x8x1xf32> to vector<8x1xf32>
    %13 = tpu.iota {dimensions = array<i32: 1>} : vector<1x256xi32>
    %14 = arith.sitofp %13 : vector<1x256xi32> to vector<1x256xf32>
    %cst_7 = arith.constant 5.000000e-01 : f32
    %15 = vector.broadcast %cst_7 : f32 to vector<1x256xf32>
    %16 = arith.addf %14, %15 : vector<1x256xf32>
    %cst_8 = arith.constant 6.250000e-02 : f32
    %17 = vector.broadcast %cst_8 : f32 to vector<1x256xf32>
    %18 = arith.mulf %16, %17 : vector<1x256xf32>
    %19 = math.floor %18 : vector<1x256xf32>
    %cst_9 = arith.constant 1.600000e+01 : f32
    %20 = vector.broadcast %cst_9 : f32 to vector<1x256xf32>
    %21 = arith.mulf %19, %20 : vector<1x256xf32>
    %22 = arith.subf %14, %21 : vector<1x256xf32>
    %23 = vector.broadcast %22 : vector<1x256xf32> to vector<8x256xf32>
    %24 = vector.broadcast %10 : vector<8x1xf32> to vector<8x256xf32>
    %25 = arith.mulf %23, %24 : vector<8x256xf32>
    %26 = vector.broadcast %19 : vector<1x256xf32> to vector<8x256xf32>
    %27 = vector.broadcast %12 : vector<8x1xf32> to vector<8x256xf32>
    %28 = arith.mulf %26, %27 : vector<8x256xf32>
    %29 = arith.addf %25, %28 : vector<8x256xf32>
    %cst_10 = arith.constant 1.000000e+00 : f32
    %30 = vector.broadcast %cst_10 : f32 to vector<2x1x8x256xf32>
    %31 = arith.addf %30, %3 : vector<2x1x8x256xf32>
    %cst_11 = arith.constant 1.000000e+00 : f32
    %32 = vector.broadcast %cst_11 : f32 to vector<2x1x8x256xf32>
    %33 = arith.divf %32, %31 : vector<2x1x8x256xf32>
    %34 = vector.shape_cast %6 : vector<8x1xf32> to vector<1x1x8x1xf32>
    %35 = vector.broadcast %34 : vector<1x1x8x1xf32> to vector<2x1x8x256xf32>
    %36 = arith.mulf %35, %33 : vector<2x1x8x256xf32>
    %37 = vector.shape_cast %8 : vector<8x1xf32> to vector<1x1x8x1xf32>
    %38 = vector.broadcast %37 : vector<1x1x8x1xf32> to vector<2x1x8x256xf32>
    %39 = arith.addf %36, %38 : vector<2x1x8x256xf32>
    %40 = arith.mulf %3, %39 : vector<2x1x8x256xf32>
    %41 = vector.shape_cast %29 : vector<8x256xf32> to vector<1x1x8x256xf32>
    %42 = vector.broadcast %41 : vector<1x1x8x256xf32> to vector<2x1x8x256xf32>
    %43 = arith.addf %40, %42 : vector<2x1x8x256xf32>
    %c0_12 = arith.constant 0 : index
    %c0_13 = arith.constant 0 : index
    %c0_14 = arith.constant 0 : index
    %c0_15 = arith.constant 0 : index
    %44 = vector.load %arg4[%c0_12, %c0_13, %c0_14, %c0_15] : memref<2x1x8x256xf32, #tpu.memory_space<vmem>>, vector<2x1x8x256xf32>
    tpu.vector_store %arg4[%c0_12, %c0_13, %c0_14, %c0_15], %43 {strides = array<i32>} : memref<2x1x8x256xf32, #tpu.memory_space<vmem>>, vector<2x1x8x256xf32>,
    return
  }
  func.func @transform_0(%arg0: i32, %arg1: i32) -> (i32, i32, i32, i32) {
    %c0_i32 = arith.constant 0 : i32
    %c0_i32_0 = arith.constant 0 : i32
    %c0_i32_1 = arith.constant 0 : i32
    return %arg0, %arg1, %c0_i32, %c0_i32_0 : i32, i32, i32, i32
  }
  func.func @transform_1(%arg0: i32, %arg1: i32) -> (i32, i32, i32, i32) {
    %c0_i32 = arith.constant 0 : i32
    %c0_i32_0 = arith.constant 0 : i32
    %c0_i32_1 = arith.constant 0 : i32
    %c0_i32_2 = arith.constant 0 : i32
    return %arg1, %c0_i32, %c0_i32_0, %c0_i32_1 : i32, i32, i32, i32
  }
  func.func @transform_2(%arg0: i32, %arg1: i32) -> (i32, i32, i32, i32) {
    %c0_i32 = arith.constant 0 : i32
    %c0_i32_0 = arith.constant 0 : i32
    %c0_i32_1 = arith.constant 0 : i32
    return %arg0, %arg1, %c0_i32, %c0_i32_0 : i32, i32, i32, i32
  }
}

</mosaic_0001>

<bundles_post_ra>
// kernel: tpu_custom_call.1
= control target key start
LH: loop header
LB: loop body
LE: loop exit
PB: predicated region body
PF: predicated region fallthrough
CT: control target
= control target key end

     0   :  { %7 = vsyncpa [#allocation4], 0  ;;  %s740_s0 = inlined_call_operand.vmem [shape: f32[2,3,8,256], index: 0, kind: input, shape index: {}]   ;;  %s741_s1 = inlined_call_operand.vmem [shape: f32[3,4,8,1], index: 1, kind: input, shape index: {}]   ;;  %s742_s2 = inlined_call_operand.hbm [shape: f32[2,3,8,256], index: 2, kind: output, shape index: {}]  }
   0x1   :  { %9 = vsyncpa [#allocation4 + $0x1], 0  ;;  %s610_s9 = smov 0   ;;  %s612_s10 = smov 0  }
   0x2   :  { %s614_s11 = smov 0   ;;  %s616_s12 = smov 0  }
   0x3   :  { %s618_s13 = smov 0   ;;  %s620_s14 = smov 0  }
   0x4 LB: > { %s413_s15 = sadd.s32 4294967295, %s588_s14   ;;  %s414_s16 = sadd.s32 4294967294, %s588_s14   ;;  %s588_s14 = sphi %s620_s14, %s15_s14   ;;  %s584_s13 = sphi %s618_s13, %s749_s13   ;;  %s580_s12 = sphi %s616_s12, %s748_s12   ;;  %s576_s11 = sphi %s614_s11, %s747_s11   ;;  %s572_s10 = sphi %s612_s10, %s746_s10   ;;  %s568_s9 = sphi %s610_s9, %s745_s9  }
   0x5   : > { %s24_s17 = sadd.s32 1, %s584_s13  ;;  %s36_s18 = sadd.s32 1, %s576_s11 }
   0x6   : > { %p25_p0 = scmp.ge.s32.totalorder %s24_s17, 3  ;;  %p43_p1 = scmp.ne.s32.totalorder %s576_s11, %s572_s10 }
   0x7   : > { %p44_p2 = scmp.eq.s32.totalorder %s588_s14, 0  ;;  %p101_p3 = scmp.eq.s32.totalorder %s413_s15, 2 }
   0x8   : > { %s751_s17 = smov (%p25_p0, %s24_s17), 0  ;;  %p106_p6 = scmp.ne.s32.totalorder %s572_s10, %s568_s9 }
   0x9   : > { %p45_p4 = por %p44_p2, %p43_p1  ;;  %p649_p5 = por %p101_p3, %p43_p1 }
   0xa   : > { %s32_s20 = ssub.s32 %s584_s13, %s751_s17  ;;  %p107_p8 = scmp.eq.s32.totalorder %s414_s16, 2 }
   0xb   : > { %p34_p7 = scmp.eq.s32.totalorder %s32_s20, 0  ;;  %p416_p10 = scmp.ge.s32.totalorder %s588_s14, 3 }
   0xc   : > { %p660_p9 = por %p107_p8, %p106_p6 }
   0xd   : > { %s658_s21 = scalar_select %p34_p7, %s576_s11, %s36_s18  }
   0xe   : > { %123 = sbr.rel (%p416_p10) target bundleno = 28 (0x1c), region = 16 }
  0x15   : > { %126 = sbr.rel (!%p45_p4) target bundleno = 28 (0x1c), region = 20  ;;  %s128_s23 = sand.u32 (%p45_p4), 1, %s576_s11  }
  0x16   : > { %s430_s24 = sshll.u32 (%p45_p4), %s584_s13, 4  ;;  %s417_s25 = sshll.u32 (%p45_p4), %s128_s23, 5 }
  0x17   : > { %s136_s28 = scalar_lea.vmem (%p45_p4), %s740_s0, %s430_s24  ;;  %s130_s29 = scalar_lea.vmem (%p45_p4), [#allocation2], %s417_s25 }
  0x18   : > { %v149_v0 = vld [vmem:[%s136_s28] sm:$0xff] (%p45_p4)  ;;  %v151_v1 = vld [vmem:[%s136_s28 + $0x8] sm:$0xff] (%p45_p4)  ;;  %v153_v2 = vld [vmem:[%s136_s28 + $0x30] sm:$0xff] (%p45_p4) }
  0x19   : > { %150 = vst [vmem:[%s130_s29] sm:$0xff] (%p45_p4), %v149_v0  ;;  %152 = vst [vmem:[%s130_s29 + $0x8] sm:$0xff] (%p45_p4), %v151_v1  ;;  %v155_v3 = vld [vmem:[%s136_s28 + $0x38] sm:$0xff] (%p45_p4) }
  0x1a   : > { %154 = vst [vmem:[%s130_s29 + $0x10] sm:$0xff] (%p45_p4), %v153_v2  ;;  %156 = vst [vmem:[%s130_s29 + $0x18] sm:$0xff] (%p45_p4), %v155_v3 }
  0x1c PF: > { %p420_p11 = scmp.ge.s32.totalorder %s588_s14, 1  ;;  %p169_p12 = scmp.lt.s32.totalorder %s588_s14, 4 }
  0x1e   : > { %p170_p13 = pnand %p420_p11, %p169_p12 }
  0x1f   : > { %p203_p0 = scmp.lt.s32.totalorder (!%p170_p13), %s580_s12, 2  ;;  %v590_v4 = vmov (!%p170_p13), 0   ;;  %s176_s7 = sand.u32 (!%p170_p13), 1, %s572_s10   ;;  %v229_v21 = vlaneseq (!%p170_p13) }
  0x20   : > { %173 = sbr.rel (%p170_p13) target bundleno = 200 (0xc8), region = 47  ;;  %493 = vset.pattern.permute.xlu1 (!%p170_p13), %v590_v4  ;;  %492 = vset.pattern.permute.xlu0 (!%p170_p13), %v590_v4  ;;  %s680_s8 = sshll.u32 (!%p170_p13), %s176_s7, 5 }
  0x21   : > { %s178_s15 = scalar_lea.vmem (!%p170_p13), [#allocation2], %s680_s8  ;;  %v230_v22 = vand.u32 (!%p170_p13), 127, %v229_v21  ;;  %s201_s16 = scalar_lea.vmem (!%p170_p13), [#allocation3], %s680_s8 }
  0x22   : > { %v209_v9 = vld [vmem:[%s178_s15] sm:$0xff] (!%p170_p13)  ;;  %v210_v10 = vld [vmem:[%s178_s15 + $0x8] sm:$0xff] (!%p170_p13)  ;;  %v211_v11 = vld [vmem:[%s178_s15 + $0x10] sm:$0xff] (!%p170_p13)  ;;  %s319_s18 = sshll.u32 (!%p170_p13), %s201_s16, 4  ;;  %s432_s20 = sshll.u32 (!%p170_p13), %s580_s12, 8  ;;  %s685_s18 = int_to_ptr.vmem [resolvable:$true] %s319_s18 }
  0x23   : > { %v212_v12 = vld [vmem:[%s178_s15 + $0x18] sm:$0xff] (!%p170_p13)  ;;  %v213_v13 = vmin.f32 (!%p170_p13), %v209_v9, 80.0  ;;  %v214_v14 = vmin.f32 (!%p170_p13), %v210_v10, 80.0  ;;  %v215_v15 = vmin.f32 (!%p170_p13), %v211_v11, 80.0  ;;  %v231_v23 = vadd.s32 (!%p170_p13), 128, %v230_v22  ;;  %s690_s25 = scalar_lea.hbm (!%p170_p13), %s742_s2, %s432_s20  ;;  %s510_s26 = scalar_lea.vmem (!%p170_p13), %s685_s18, 512 }
  0x24   : > { %v216_v16 = vmin.f32 (!%p170_p13), %v212_v12, 80.0  ;;  %v232_v27 = vcvt.s32.f32 (!%p170_p13), %v230_v22  ;;  %p511_p1 = scmp.ne.s32.totalorder (!%p170_p13), %s685_s18, %s510_s26  ;;  %s591_s27 = smov (!%p170_p13), [#allocation3]  }
  0x25   : > { %v217_v17 = vmul.f32 (!%p170_p13), 1.442695, %v213_v13  ;;  %v219_v18 = vmul.f32 (!%p170_p13), 1.442695, %v214_v14  ;;  %v221_v19 = vmul.f32 (!%p170_p13), 1.442695, %v215_v15  ;;  %v233_v28 = vcvt.s32.f32 (!%p170_p13), %v231_v23 }
  0x26   : > { %v223_v20 = vmul.f32 (!%p170_p13), 1.442695, %v216_v16  ;;  %v234_v33 = vadd.f32 (!%p170_p13), 0.5, %v232_v27  ;;  %p512_p2 = pnand (!%p170_p13), %p511_p1, %p649_p5  ;;  %s514_s28 = sshll.u32 (!%p170_p13), %s591_s27, 4  ;;  %s515_s28 = int_to_ptr.vmem [resolvable:$false] %s514_s28 }
  0x27   : > { %s204_s30 = scalar_select %p203_p0, %s580_s12, 2  ;;  %494 = vpow2.f32 %v217_v17  ;;  %v235_v34 = vadd.f32 0.5, %v233_v28 }
  0x28   : > { %496 = vpow2.f32 %v219_v18  ;;  %v236_v36 = vmul.f32 0.0625, %v234_v33  ;;  %s694_s12 = scalar_lea.sflag [#allocation4], %s176_s7  ;;  %p513_p3 = pneg %p512_p2 }
  0x29   : > { %s431_s3 = sshll.u32 %s204_s30, 5  ;;  %498 = vpow2.f32 %v221_v19  ;;  %v237_v37 = vmul.f32 0.0625, %v235_v34  ;;  %s516_s29 = scalar_lea.vmem %s515_s28, 1024 }
  0x2a   : > { %s207_s6 = scalar_lea.vmem %s741_s1, %s431_s3  ;;  %500 = vpow2.f32 %v223_v20  ;;  %v238_v38 = vfloor.f32 %v236_v36  ;;  %p517_p4 = scmp.lt.s32.totalorder %s685_s18, %s515_s28 }
  0x2b   : > { %v228_v5 = vld [vmem:[%s207_s6 + $0x18] sm:$0xff]  ;;  %v225_v6 = vld [vmem:[%s207_s6] sm:$0xff]  ;;  %v226_v7 = vld [vmem:[%s207_s6 + $0x8] sm:$0xff]  ;;  %v239_v39 = vfloor.f32 %v237_v37  ;;  %p518_p6 = scmp.lt.s32.totalorder %s516_s29, %s510_s26 }
  0x2c   : > { %253 = vperm.xlu1 %493, %v228_v5   ;;  %274 = vperm.xlu0 %492, %v225_v6   ;;  %v227_v8 = vld [vmem:[%s207_s6 + $0x10] sm:$0xff]  ;;  %v240_v42 = vmul.f32 16.0, %v238_v38 }
  0x2d   : > { %v241_v43 = vmul.f32 16.0, %v239_v39  ;;  %p519_p7 = por %p518_p6, %p517_p4 }
  0x2e   : > { %v242_v48 = vsub.f32 %v232_v27, %v240_v42 }
  0x2f   : > { %v243_v49 = vsub.f32 %v233_v28, %v241_v43  ;;  %p520_p8 = pnand %p519_p7, %p513_p3 }
  0x30   : > { %283 = vperm.xlu1 %493, %v226_v7   ;;  %246 = vperm.xlu0 %492, %v227_v8  }
  0x31   : > { %v495_v24 = vpop.eup %494 }
  0x32   : > { %v497_v25 = vpop.eup %496  ;;  %v260_v30 = vadd.f32 1.0, %v495_v24 }
  0x33   : > { %v499_v26 = vpop.eup %498  ;;  %v261_v31 = vadd.f32 1.0, %v497_v25 }
  0x34   : > { %v501_v29 = vpop.eup %500  ;;  %v262_v32 = vadd.f32 1.0, %v499_v26  ;;  %502 = vrcp.f32 %v260_v30 }
  0x35   : > { %v263_v35 = vadd.f32 1.0, %v501_v29  ;;  %504 = vrcp.f32 %v261_v31 }
  0x36   : > { %506 = vrcp.f32 %v262_v32 }
  0x37   : > { %508 = vrcp.f32 %v263_v35 }
  0x3e   : > { %v503_v40 = vpop.eup %502 }
  0x3f   : > { %v505_v41 = vpop.eup %504 }
  0x40   : > { %v507_v44 = vpop.eup %506 }
  0x41   : > { %v509_v45 = vpop.eup %508 }
  0xab   : > { %v254_v46 = vpop.permute.xlu1 %253  ;;  %v275_v47 = vpop.permute.xlu0 %274 }
  0xac   : > { %v277_v50 = vmul.f32 %v503_v40, %v275_v47  ;;  %v278_v51 = vmul.f32 %v505_v41, %v275_v47  ;;  %v279_v52 = vmul.f32 %v507_v44, %v275_v47  ;;  %v280_v53 = vmul.f32 %v509_v45, %v275_v47 }
  0xad   : > { %v256_v60 = vmul.f32 %v254_v46, %v238_v38  ;;  %v257_v61 = vmul.f32 %v254_v46, %v239_v39 }
  0xaf   : > { %v284_v54 = vpop.permute.xlu1 %283  ;;  %v247_v55 = vpop.permute.xlu0 %246 }
  0xb0   : > { %v286_v56 = vadd.f32 %v284_v54, %v277_v50  ;;  %v287_v57 = vadd.f32 %v284_v54, %v278_v51  ;;  %v288_v58 = vadd.f32 %v284_v54, %v279_v52  ;;  %v289_v59 = vadd.f32 %v284_v54, %v280_v53 }
  0xb1   : > { %v249_v62 = vmul.f32 %v247_v55, %v242_v48  ;;  %v250_v63 = vmul.f32 %v247_v55, %v243_v49 }
  0xb2   : > { %v290_v0 = vmul.f32 %v495_v24, %v286_v56  ;;  %v291_v1 = vmul.f32 %v497_v25, %v287_v57  ;;  %v292_v2 = vmul.f32 %v499_v26, %v288_v58  ;;  %v293_v3 = vmul.f32 %v501_v29, %v289_v59 }
  0xb3   : > { %v258_v4 = vadd.f32 %v256_v60, %v249_v62  ;;  %v259_v5 = vadd.f32 %v257_v61, %v250_v63 }
  0xb5   : > { %v294_v6 = vadd.f32 %v290_v0, %v258_v4  ;;  %v295_v7 = vadd.f32 %v291_v1, %v259_v5  ;;  %v296_v8 = vadd.f32 %v292_v2, %v258_v4  ;;  %v297_v9 = vadd.f32 %v293_v3, %v259_v5 }
  0xb7   : > { %298 = vst [vmem:[%s201_s16] sm:$0xff] %v294_v6  ;;  %299 = vst [vmem:[%s201_s16 + $0x8] sm:$0xff] %v295_v7 }
  0xb8   : > { %300 = vst [vmem:[%s201_s16 + $0x10] sm:$0xff] %v296_v8  ;;  %301 = vst [vmem:[%s201_s16 + $0x18] sm:$0xff] %v297_v9 }
  0xb9   : > { %523 = shalt.err (!%p520_p8)
}
  0xba   : > { %s524_s30 = scalar_lea.hbm %s690_s25, 512  ;;  %s528_s5 = scalar_lea.hbm %s742_s2, 1536 }
  0xbb   : > { %p525_p10 = scmp.ne.s32.totalorder %s690_s25, %s524_s30  ;;  %p529_p13 = scmp.lt.u32.totalorder %s690_s25, %s742_s2 }
  0xbc   : > { %p530_p0 = scmp.lt.u32.totalorder %s528_s5, %s524_s30  ;;  %p532_p2 = scmp.lt.u32.totalorder %s524_s30, %s690_s25 }
  0xbd   : > { %p526_p11 = pnand %p525_p10, %p649_p5 }
  0xbe   : > { %p531_p1 = por %p530_p0, %p529_p13 }
  0xbf   : > { %p527_p12 = pneg %p526_p11 }
  0xc0   : > { %p533_p3 = por %p532_p2, %p531_p1 }
  0xc2   : > { %p534_p4 = pnand %p533_p3, %p527_p12 }
  0xc4   : > { %537 = shalt.err (!%p534_p4)
}
  0xc5   : > { %s592_s8 = smov 256   ;;  %s593_s15 = smov 768  }
  0xc6   : > { %s594_s16 = smov 16  }
  0xc7   : > { %433 = dma.vmem_to_hbm [thread:$0]  (%p649_p5), %s685_s18, 512, %s690_s25, %s694_s12, %s592_s8, %s593_s15, %s594_s16  }
  0xc8 PF: > { %p439_p6 = scmp.ge.s32.totalorder %s588_s14, 2  ;;  %s334_s20 = sand.u32 1, %s568_s9  }
  0xc9   : > { %s335_s23 = scalar_lea.sflag [#allocation4], %s334_s20 }
  0xca   : > { %p436_p7 = pnand %p439_p6, %p660_p9 }
  0xcc   : > { %563 = dma.done.wait (!%p436_p7), %s335_s23, 512  }
  0xcd   : > { %565 = vsyncadd (!%p436_p7), %s335_s23, 4294966784  ;;  %s15_s14 = sadd.s32 1, %s588_s14   ;;  %s745_s9 = smov %s572_s10 }
  0xce   : > { %p12_p8 = scmp.ge.s32.totalorder %s15_s14, 5   ;;  %s746_s10 = smov %s576_s11 }
  0xcf   : > { %s747_s11 = smov %s658_s21  ;;  %s748_s12 = smov %s584_s13 }
  0xd0   : > { %s749_s13 = smov %s751_s17  ;;  %14 = sbr.rel (!%p12_p8) target bundleno = 4 (0x4), region = 94 }
  0xd7   :  { %340 = vsyncpa [#allocation4], 1 }
  0xd8   :  { %342 = vsyncpa [#allocation4 + $0x1], 1 }

</bundles_post_ra>
